<compile_context>
chip_gen: v5e
topology: v5e:2x2
jax: 0.10.0
libtpu: 0.0.40
codegen_flags: <defaults>
</compile_context>

<pallas_src>
from functools import partial

import jax
import jax.numpy as jnp
from jax.experimental import pallas as pl
from jax.experimental.pallas import tpu as pltpu

_TM = 512  # M-tile: largest size safe on v5e/v6e/v7x with default scoped VMEM.


def _round_up(v, m):
    return (v + m - 1) // m * m


def _patch_embed_kernel(x_ref, w_ref, b_ref, o_ref):
    # x_ref: (TM, K) bf16 patch tile (streamed, double-buffered)
    # w_ref: (K, N)  bf16 flattened conv weight (VMEM-resident, constant idx)
    # b_ref: (1, N)  f32 bias (VMEM-resident)
    # o_ref: (TM, N) output tile
    acc = jnp.dot(x_ref[...], w_ref[...], preferred_element_type=jnp.float32)
    o_ref[...] = (acc + b_ref[...]).astype(o_ref.dtype)


@partial(jax.jit, static_argnames=("patch_size", "out_dtype"))
def patch_embed(x, weight, bias, patch_size, out_dtype=None):
    """Forward pass of PatchEmbed.

    x:      (B, C, H, W)          -- NCHW, like PyTorch
    weight: (embed_dim, C, P, P)  -- PyTorch Conv2d weight layout
    bias:   (embed_dim,)
    out_dtype: output dtype (default x.dtype; bf16 recommended on v6e/v7x)
    returns (B, n_patches, embed_dim)
    """
    B, C, H, W = x.shape
    E = weight.shape[0]
    P = patch_size
    Hp, Wp = H // P, W // P
    n_patches = Hp * Wp
    out_dtype = x.dtype if out_dtype is None else jnp.dtype(out_dtype)

    # PyTorch Conv2d(stride=kernel) silently drops any remainder -> crop.
    x = x[:, :, : Hp * P, : Wp * P]

    # --- glue (one fused XLA copy under this jit): cast to bf16, extract
    #     patches, flatten each in (C, ph, pw) order, pad.  Materialized once,
    #     in bf16. ---
    K = C * P * P
    K_pad = _round_up(K, 128)
    N_pad = _round_up(E, 128)

    xb = x.astype(jnp.bfloat16)
    patches = xb.reshape(B, C, Hp, P, Wp, P)
    patches = jnp.transpose(patches, (0, 2, 4, 1, 3, 5))
    patches = patches.reshape(B * n_patches, K)
    M = B * n_patches

    TM = min(_TM, _round_up(M, 8))
    num_tiles = -(-M // TM)
    if num_tiles > 1 and num_tiles % 2:
        num_tiles += 1  # even step count -> balanced megacore halves on v7x
    M_pad = num_tiles * TM

    patches_p = jnp.pad(patches, ((0, M_pad - M), (0, K_pad - K)))
    w_flat = weight.reshape(E, K).T  # (K, E), rows ordered (c, ph, pw)
    w_p = jnp.pad(w_flat, ((0, K_pad - K), (0, N_pad - E))).astype(jnp.bfloat16)
    b_p = jnp.pad(bias.astype(jnp.float32), (0, N_pad - E)).reshape(1, N_pad)

    out_itemsize = jnp.dtype(out_dtype).itemsize
    cost = pl.CostEstimate(
        flops=2 * M_pad * N_pad * K_pad,
        transcendentals=0,
        bytes_accessed=(M_pad * K_pad + K_pad * N_pad) * 2
        + N_pad * 4
        + M_pad * N_pad * out_itemsize,
    )

    out = pl.pallas_call(
        _patch_embed_kernel,
        out_shape=jax.ShapeDtypeStruct((M_pad, N_pad), out_dtype),
        grid=(num_tiles,),
        in_specs=[
            pl.BlockSpec((TM, K_pad), lambda i: (i, 0)),      # patch tile (streamed)
            pl.BlockSpec((K_pad, N_pad), lambda i: (0, 0)),   # weight: VMEM-resident
            pl.BlockSpec((1, N_pad), lambda i: (0, 0)),       # bias:   VMEM-resident
        ],
        out_specs=pl.BlockSpec((TM, N_pad), lambda i: (i, 0)),
        compiler_params=pltpu.CompilerParams(
            dimension_semantics=("parallel",),  # megacore sharding on v7x
        ),
        cost_estimate=cost,
    )(patches_p, w_p, b_p)

    return out[:M, :E].reshape(B, n_patches, E)


if __name__ == "__main__":
    # Small shapes consistent with the module: img_size=16, patch_size=4,
    # in_chans=4, embed_dim=32 -> n_patches = (16//4)**2 = 16
    B, C, H, W = 2, 4, 16, 16
    P = 4
    E = 32

    key = jax.random.PRNGKey(0)
    kx, kw, kb = jax.random.split(key, 3)
    x = jax.random.normal(kx, (B, C, H, W), dtype=jnp.float32)
    weight = jax.random.normal(kw, (E, C, P, P), dtype=jnp.float32) * 0.02
    bias = jax.random.normal(kb, (E,), dtype=jnp.float32) * 0.02

    out = patch_embed(x, weight, bias, P)
    out = jax.block_until_ready(out)

    # Reference: strided conv via einsum over patches (pure JAX, f32).
    Hp, Wp = H // P, W // P
    ref_patches = jnp.transpose(
        x.reshape(B, C, Hp, P, Wp, P), (0, 2, 4, 1, 3, 5)
    ).reshape(B, Hp * Wp, C * P * P)
    ref = jnp.einsum("bnk,ek->bne", ref_patches, weight.reshape(E, C * P * P)) + bias

    assert out.shape == (B, Hp * Wp, E)
    assert out.dtype == x.dtype
    # Tolerance accounts for bf16 MXU operands (accumulation + bias are f32).
    assert jnp.allclose(out, ref, atol=2e-2, rtol=2e-2)

    print("KERNEL_OK")
</pallas_src>

<mosaic_0001>
module attributes {stable_mosaic.version = 11 : i64} {
  func.func @_patch_embed_kernel(%arg0: i32, %arg1: memref<32x128xbf16, #tpu.memory_space<vmem>>, %arg2: memref<128x128xbf16, #tpu.memory_space<vmem>>, %arg3: memref<1x128xf32, #tpu.memory_space<vmem>>, %arg4: memref<32x128xf32, #tpu.memory_space<vmem>>) attributes {dimension_semantics = [#tpu.dimension_semantics<parallel>], iteration_bounds = array<i64: 1>, scalar_prefetch = 0 : i64, scratch_operands = 0 : i64, tpu.core_type = #tpu.core_type<tc>, window_params = [{transform_indices = @transform_0, window_bounds = array<i64: 32, 128>}, {pipeline_mode = #tpu.pipeline_mode<synchronous>, transform_indices = @transform_1, window_bounds = array<i64: 128, 128>}, {pipeline_mode = #tpu.pipeline_mode<synchronous>, transform_indices = @transform_2, window_bounds = array<i64: 1, 128>}, {transform_indices = @transform_3, window_bounds = array<i64: 32, 128>}]} {
    %c0 = arith.constant 0 : index
    %c0_0 = arith.constant 0 : index
    %0 = vector.load %arg1[%c0, %c0_0] : memref<32x128xbf16, #tpu.memory_space<vmem>>, vector<32x128xbf16>
    %c0_1 = arith.constant 0 : index
    %c0_2 = arith.constant 0 : index
    %1 = vector.load %arg2[%c0_1, %c0_2] : memref<128x128xbf16, #tpu.memory_space<vmem>>, vector<128x128xbf16>
    %cst = arith.constant dense<0.000000e+00> : vector<32x128xf32>
    %2 = tpu.matmul %0, %1, %cst {dimension_numbers = #tpu.dot_dimension_numbers<[1], [0], [0], [1], [0, 0, 1, 1], [], []>} : vector<32x128xbf16>, vector<128x128xbf16>, vector<32x128xf32> -> vector<32x128xf32>
    %c0_3 = arith.constant 0 : index
    %c0_4 = arith.constant 0 : index
    %3 = vector.load %arg3[%c0_3, %c0_4] : memref<1x128xf32, #tpu.memory_space<vmem>>, vector<1x128xf32>
    %4 = vector.broadcast %3 : vector<1x128xf32> to vector<32x128xf32>
    %5 = arith.addf %2, %4 : vector<32x128xf32>
    %c0_5 = arith.constant 0 : index
    %c0_6 = arith.constant 0 : index
    %6 = vector.load %arg4[%c0_5, %c0_6] : memref<32x128xf32, #tpu.memory_space<vmem>>, vector<32x128xf32>
    tpu.vector_store %arg4[%c0_5, %c0_6], %5 {strides = array<i32>} : memref<32x128xf32, #tpu.memory_space<vmem>>, vector<32x128xf32>,
    return
  }
  func.func @transform_0(%arg0: i32) -> (i32, i32) {
    %c0_i32 = arith.constant 0 : i32
    %c0_i32_0 = arith.constant 0 : i32
    return %arg0, %c0_i32 : i32, i32
  }
  func.func @transform_1(%arg0: i32) -> (i32, i32) {
    %c0_i32 = arith.constant 0 : i32
    %c0_i32_0 = arith.constant 0 : i32
    %c0_i32_1 = arith.constant 0 : i32
    return %c0_i32, %c0_i32_0 : i32, i32
  }
  func.func @transform_2(%arg0: i32) -> (i32, i32) {
    %c0_i32 = arith.constant 0 : i32
    %c0_i32_0 = arith.constant 0 : i32
    %c0_i32_1 = arith.constant 0 : i32
    return %c0_i32, %c0_i32_0 : i32, i32
  }
  func.func @transform_3(%arg0: i32) -> (i32, i32) {
    %c0_i32 = arith.constant 0 : i32
    %c0_i32_0 = arith.constant 0 : i32
    return %arg0, %c0_i32 : i32, i32
  }
}

</mosaic_0001>

<bundles_post_ra>
// kernel: patch_embed.1
= control target key start
LH: loop header
LB: loop body
LE: loop exit
PB: predicated region body
PF: predicated region fallthrough
CT: control target
= control target key end

     0   :  { %s287_s0 = inlined_call_operand.vmem [shape: bf16[32,128], index: 0, kind: input, shape index: {}]   ;;  %s288_s1 = inlined_call_operand.vmem [shape: bf16[128,128], index: 1, kind: input, shape index: {}]   ;;  %s289_s2 = inlined_call_operand.vmem [shape: f32[1,128], index: 2, kind: input, shape index: {}]   ;;  %s290_s3 = inlined_call_operand.hbm [shape: f32[32,128], index: 3, kind: output, shape index: {}]  }
   0x1   :  { %v189_v0 = vld [vmem:[%s288_s1 + $0x38] sm:$0xff]  ;;  %v188_v1 = vld [vmem:[%s288_s1 + $0x30] sm:$0xff] }
   0x2   :  { %99 = vmatpush.bf16.msra.mxu0 %v189_v0  ;;  %190 = vmatpush.bf16.msra.mxu1 %v189_v0 }
   0x3   :  { %8 = vsyncpa [#allocation3], 0  ;;  %v187_v2 = vld [vmem:[%s288_s1 + $0x28] sm:$0xff]  ;;  %v186_v3 = vld [vmem:[%s288_s1 + $0x20] sm:$0xff]  ;;  %s230_s10 = smov 8  }
   0x4   :  { %v185_v4 = vld [vmem:[%s288_s1 + $0x18] sm:$0xff]  ;;  %v184_v5 = vld [vmem:[%s288_s1 + $0x10] sm:$0xff]  ;;  %v183_v6 = vld [vmem:[%s288_s1 + $0x8] sm:$0xff] }
   0x5   :  { %v182_v7 = vld [vmem:[%s288_s1] sm:$0xff]  ;;  %v181_v9 = vld [vmem:[%s287_s0 + $0x8] sm:$0xff]  ;;  %s228_s1 = smov [#allocation2]  }
   0x6   :  { %100 = vmatpush.bf16.msra.mxu0 %v188_v1  ;;  %191 = vmatpush.bf16.msra.mxu1 %v188_v1  ;;  %v180_v8 = vld [vmem:[%s287_s0] sm:$0xff]  ;;  %s126_s7 = sshll.u32 %s228_s1, 4  ;;  %s128_s0 = sshll.u32 %s290_s3, 4  ;;  %s127_s7 = int_to_ptr.vmem [resolvable:$true] %s126_s7  ;;  %s129_s0 = int_to_ptr.hbm [resolvable:$true] %s128_s0 }
   0x7   :  { %v201_v10 = vld [vmem:[%s289_s2] ss:$0 sm:$0xff]  ;;  %s229_s2 = smov 128  }
   0xa   :  { %101 = vmatpush.bf16.msra.mxu0 %v187_v2  ;;  %192 = vmatpush.bf16.msra.mxu1 %v187_v2 }
   0xe   :  { %102 = vmatpush.bf16.msra.mxu0 %v186_v3  ;;  %193 = vmatpush.bf16.msra.mxu1 %v186_v3 }
  0x12   :  { %103 = vmatpush.bf16.msra.mxu0 %v185_v4  ;;  %194 = vmatpush.bf16.msra.mxu1 %v185_v4 }
  0x16   :  { %104 = vmatpush.bf16.msra.mxu0 %v184_v5  ;;  %195 = vmatpush.bf16.msra.mxu1 %v184_v5 }
  0x1a   :  { %105 = vmatpush.bf16.msra.mxu0 %v183_v6  ;;  %196 = vmatpush.bf16.msra.mxu1 %v183_v6 }
  0x1e   :  { %106 = vmatpush.bf16.msra.mxu0 %v182_v7  ;;  %197 = vmatpush.bf16.msra.mxu1 %v182_v7 }
  0x21   :  { %107 = vmatmul.bf16.vlgmr.msra.gmra.mxu0 %v180_v8  ;;  %112 = vmatmul.bf16.vlgmr.msra.gmra.mxu1 %v181_v9 }
  0x9e   :  { %v108_v11 = vpop.f32.mrf.mxu0  ;;  %v113_v12 = vpop.f32.mrf.mxu1 }
  0x9f   :  { %v109_v13 = vadd.f32 %v201_v10, %v108_v11  ;;  %v114_v14 = vadd.f32 %v201_v10, %v113_v12 }
  0xa1   :  { %118 = vst [vmem:[#allocation2] sm:$0xff] %v109_v13 }
  0xa2   :  { %120 = vst [vmem:[#allocation2 + $0x10] sm:$0xff] %v114_v14 }
  0xa6   :  { %v110_v15 = vpop.f32.mrf.mxu0  ;;  %v115_v16 = vpop.f32.mrf.mxu1 }
  0xa7   :  { %v111_v17 = vadd.f32 %v201_v10, %v110_v15  ;;  %v116_v18 = vadd.f32 %v201_v10, %v115_v16 }
  0xa9   :  { %119 = vst [vmem:[#allocation2 + $0x8] sm:$0xff] %v111_v17 }
  0xaa   :  { %121 = vst [vmem:[#allocation2 + $0x18] sm:$0xff] %v116_v18 }
  0xab   :  { %134 = dma.vmem_to_hbm [thread:$0]  %s127_s7, 512, %s129_s0, [#allocation3], %s229_s2, %s229_s2, %s230_s10  }
  0xac   :  { %226 = dma.done.wait [#allocation3], 512  }
  0xad   :  { %227 = vsyncadd [#allocation3], 4294966784 }
  0xae   :  { %139 = vsyncpa [#allocation3], 1 }

</bundles_post_ra>
